<compile_context>
chip_gen: v6e
topology: v6e:2x2x1
jax: 0.10.0
libtpu: 0.0.40
codegen_flags: <defaults>
</compile_context>

<pallas_src>
import jax
import jax.numpy as jnp
from jax.experimental import pallas as pl
from jax.experimental.pallas import tpu as pltpu


# ---------------------------------------------------------------------------
# Helpers
# ---------------------------------------------------------------------------

def _round_up(x, m):
    return (x + m - 1) // m * m


def _pad2d(x, rows, cols):
    r, c = x.shape
    if r == rows and c == cols:
        return x
    return jnp.pad(x, ((0, rows - r), (0, cols - c)))


def _vmem_budget_bytes():
    """Generation-aware VMEM budget for pallas_call.

    v7x has 64 MiB / TensorCore -> stay around 48 MiB; v5e/v6e have 128 MiB ->
    allow up to ~112 MiB.  Always leave >=16 MiB headroom for Mosaic's
    internal scratch / pipelining bookkeeping.
    """
    cap = 64 << 20
    try:
        info = pltpu.get_tpu_info()
        cap = int(getattr(info, "vmem_capacity_bytes", cap) or cap)
    except Exception:
        pass
    return max(min(cap - (16 << 20), 112 << 20), 16 << 20)


def _pick_lane_tile(Np, per_col_bytes, resident_bytes, budget, min_tiles=1):
    """Largest lane-dense (x128) tile of the fused-feature axis whose
    double-buffered footprint fits `budget`.  Prefers >= `min_tiles` roughly
    even grid steps (so v7x megacore gets both cores work); one extra step
    costs ~0.35us which is negligible on every generation."""
    avail = max(budget - 2 * resident_bytes, 2 * 128 * per_col_bytes)
    tn = max((avail // (2 * per_col_bytes)) // 128 * 128, 128)
    tn = min(int(tn), Np)
    want_tiles = min_tiles if Np >= 128 * min_tiles else 1
    ntiles = max(pl.cdiv(Np, tn), want_tiles)
    tn = min(_round_up(pl.cdiv(Np, ntiles), 128), Np)
    return int(tn)


# ---------------------------------------------------------------------------
# Kernels
# ---------------------------------------------------------------------------

def _ada_kernel(x_ref, w_ref, b_ref, o_ref):
    # x: (Bp, dim)  w: (dim, tn)  b: (1, tn)  ->  o: (Bp, tn)
    acc = jnp.dot(x_ref[...], w_ref[...], preferred_element_type=jnp.float32)
    o_ref[...] = (acc + b_ref[...].astype(jnp.float32)).astype(o_ref.dtype)


def _ada_single_kernel(ta_ref, tbl_ref, o_ref):
    # ta: (tb, Np)  tbl: (1, Np)  ->  o: (tb, Np)
    o_ref[...] = (ta_ref[...].astype(jnp.float32)
                  + tbl_ref[...].astype(jnp.float32)).astype(o_ref.dtype)


def _sola_kernel(h_ref, bm_ref, ta_ref, o_ref):
    # h: (Bp, 6r)  bm: (6r, tn)  ta: (Bp, tn)
    lora = jnp.dot(h_ref[...], bm_ref[...], preferred_element_type=jnp.float32)
    o_ref[...] = (ta_ref[...].astype(jnp.float32) + lora).astype(o_ref.dtype)


def _sola_bias_kernel(h_ref, bm_ref, ta_ref, tbl_ref, o_ref):
    lora = jnp.dot(h_ref[...], bm_ref[...], preferred_element_type=jnp.float32)
    o_ref[...] = (ta_ref[...].astype(jnp.float32) + lora
                  + tbl_ref[...].astype(jnp.float32)).astype(o_ref.dtype)


# ---------------------------------------------------------------------------
# One-time parameter preparation (hoisted OUT of the per-call hot path)
# ---------------------------------------------------------------------------

def prepare_ada_params(w, b):
    """Pad Linear(dim, 6*dim) params once at load time.  A no-op when
    6*dim % 128 == 0 (true for typical dim=1152/1536).  Pass the weight in
    bf16 to halve the dominant HBM read."""
    # TODO(synk): optional fp8(e4m3)+per-column-scale weight path for the v7x
    # MXU (v5e/v6e do not consume fp8 natively, so it must be gated).
    dim, N = w.shape
    Np = _round_up(N, 128)
    return _pad2d(w, dim, Np), _pad2d(b.reshape(1, N), 1, Np), N


def prepare_single_params(scale_shift_table):
    six, dim = scale_shift_table.shape
    N = six * dim
    Np = _round_up(N, 128)
    return _pad2d(scale_shift_table.reshape(1, N), 1, Np), N


def prepare_sola_params(lora_a, lora_b, scale_shift_table=None):
    R6, N = lora_b.shape
    Np = _round_up(N, 128)
    bm = _pad2d(lora_b, R6, Np)
    tbl = (None if scale_shift_table is None
           else _pad2d(scale_shift_table.reshape(1, N), 1, Np))
    return lora_a, bm, tbl, N


# ---------------------------------------------------------------------------
# Wrappers (hot path)
# ---------------------------------------------------------------------------

def adaln_ada(time_token, wp, bp, N):
    """'ada': Linear(dim, 6*dim, bias=True)(time_token) -> (B, 6, dim).
    `wp`, `bp` come from prepare_ada_params (already lane-padded)."""
    B, dim = time_token.shape
    Np = wp.shape[1]
    out_dtype = time_token.dtype
    out_isz = jnp.dtype(out_dtype).itemsize

    Bp = _round_up(B, 8)
    x = time_token
    if x.dtype != wp.dtype:
        # cast once here (not per grid step); feed the MXU natively in the
        # (possibly narrow) weight dtype, accumulate in f32 inside the kernel
        x = x.astype(wp.dtype)
    x = _pad2d(x, Bp, dim)

    budget = _vmem_budget_bytes()
    per_col = dim * wp.dtype.itemsize + bp.dtype.itemsize + Bp * out_isz
    resident = Bp * dim * x.dtype.itemsize
    tn = _pick_lane_tile(Np, per_col, resident, budget, min_tiles=2)
    grid = (pl.cdiv(Np, tn),)
    vmem_limit = int(min(budget, 2 * resident + 2 * per_col * tn + (8 << 20)))

    cost = pl.CostEstimate(
        flops=2 * Bp * dim * Np,
        bytes_accessed=int(x.size * x.dtype.itemsize
                           + wp.size * wp.dtype.itemsize
                           + bp.size * bp.dtype.itemsize
                           + Bp * Np * out_isz),
        transcendentals=0)

    out = pl.pallas_call(
        _ada_kernel,
        out_shape=jax.ShapeDtypeStruct((Bp, Np), out_dtype),
        grid=grid,
        in_specs=[
            pl.BlockSpec((Bp, dim), lambda j: (0, 0)),   # activations: resident
            pl.BlockSpec((dim, tn), lambda j: (0, j)),   # weight tile (pipelined)
            pl.BlockSpec((1, tn), lambda j: (0, j)),     # bias tile
        ],
        out_specs=pl.BlockSpec((Bp, tn), lambda j: (0, j)),
        compiler_params=pltpu.CompilerParams(
            dimension_semantics=("parallel",),
            vmem_limit_bytes=vmem_limit),
        cost_estimate=cost,
    )(x, wp, bp)
    return out[:B, :N].reshape(B, 6, N // 6)


def adaln_ada_single(time_ada, tbl, N, *, use_pallas=None):
    """'ada_single': scale_shift_table[None] + time_ada.reshape(B, 6, dim)."""
    B = time_ada.shape[0]
    dim = N // 6
    if use_pallas is None:
        # For tiny workloads the launch + pad/slice copies exceed the ~B*N*8
        # bytes of real work; let XLA fuse the broadcast add instead.
        use_pallas = B * N >= (1 << 20)
    if not use_pallas:
        return time_ada.reshape(B, 6, dim) + tbl[0, :N].reshape(1, 6, dim)

    out_dtype = time_ada.dtype
    out_isz = jnp.dtype(out_dtype).itemsize
    Np = tbl.shape[1]
    Bp = _round_up(B, 8)
    ta = _pad2d(time_ada.reshape(B, N), Bp, Np)

    budget = _vmem_budget_bytes()
    per_row = Np * (ta.dtype.itemsize + out_isz)
    tb = max((max(budget - 2 * Np * tbl.dtype.itemsize, 0)
              // (2 * per_row)) // 8 * 8, 8)
    tb = int(min(tb, Bp))
    grid = (pl.cdiv(Bp, tb),)
    vmem_limit = int(min(budget,
                         2 * tb * per_row + 2 * Np * tbl.dtype.itemsize
                         + (8 << 20)))

    cost = pl.CostEstimate(
        flops=Bp * Np,
        bytes_accessed=int(Bp * Np * (ta.dtype.itemsize + out_isz)
                           + Np * tbl.dtype.itemsize),
        transcendentals=0)

    out = pl.pallas_call(
        _ada_single_kernel,
        out_shape=jax.ShapeDtypeStruct((Bp, Np), out_dtype),
        grid=grid,
        in_specs=[
            pl.BlockSpec((tb, Np), lambda i: (i, 0)),
            pl.BlockSpec((1, Np), lambda i: (0, 0)),
        ],
        out_specs=pl.BlockSpec((tb, Np), lambda i: (i, 0)),
        compiler_params=pltpu.CompilerParams(
            dimension_semantics=("parallel",),
            vmem_limit_bytes=vmem_limit),
        cost_estimate=cost,
    )(ta, tbl)
    return out[:B, :N].reshape(B, 6, dim)


def adaln_ada_sola(time_token, time_ada, lora_a, bm, scaling, N, tbl=None):
    """'ada_sola' / 'ada_sola_bias' (tbl=None -> no scale_shift_table).
    `lora_a`, `bm`, `tbl` come from prepare_sola_params."""
    B, dim = time_token.shape
    R6 = lora_a.shape[1]
    Np = bm.shape[1]
    out_dtype = time_ada.dtype
    out_isz = jnp.dtype(out_dtype).itemsize
    Bp = _round_up(B, 8)

    # Tiny first matmul hoisted here: x and lora_a would otherwise sit resident
    # in VMEM and be re-multiplied on every grid step.  `scaling` is applied to
    # the small (B, 6r) intermediate (not the (B, 6*dim) result) and remains a
    # traceable value (no compile-time baking).
    h = (time_token.astype(jnp.float32) @ lora_a.astype(jnp.float32)) * scaling
    h = _pad2d(h, Bp, R6)
    ta = _pad2d(time_ada.reshape(B, N), Bp, Np)

    budget = _vmem_budget_bytes()
    per_col = (R6 * bm.dtype.itemsize + Bp * (ta.dtype.itemsize + out_isz)
               + (tbl.dtype.itemsize if tbl is not None else 0))
    resident = Bp * R6 * h.dtype.itemsize
    # Total sola footprint is only ~1-2 MB -> this collapses to 1-2 grid steps
    # (2 even steps so both v7x TensorCores get work).
    tn = _pick_lane_tile(Np, per_col, resident, budget, min_tiles=2)
    grid = (pl.cdiv(Np, tn),)
    vmem_limit = int(min(budget, 2 * resident + 2 * per_col * tn + (8 << 20)))

    operands = [h, bm, ta]
    in_specs = [
        pl.BlockSpec((Bp, R6), lambda j: (0, 0)),   # LoRA intermediate: resident
        pl.BlockSpec((R6, tn), lambda j: (0, j)),   # lora_b tile (pipelined)
        pl.BlockSpec((Bp, tn), lambda j: (0, j)),   # time_ada tile
    ]
    kernel = _sola_kernel
    if tbl is not None:
        operands.append(tbl)
        in_specs.append(pl.BlockSpec((1, tn), lambda j: (0, j)))
        kernel = _sola_bias_kernel

    cost = pl.CostEstimate(
        flops=2 * Bp * R6 * Np + 2 * Bp * Np,
        bytes_accessed=int(sum(op.size * op.dtype.itemsize for op in operands)
                           + Bp * Np * out_isz),
        transcendentals=0)

    out = pl.pallas_call(
        kernel,
        out_shape=jax.ShapeDtypeStruct((Bp, Np), out_dtype),
        grid=grid,
        in_specs=in_specs,
        out_specs=pl.BlockSpec((Bp, tn), lambda j: (0, j)),
        compiler_params=pltpu.CompilerParams(
            dimension_semantics=("parallel",),
            vmem_limit_bytes=vmem_limit),
        cost_estimate=cost,
    )(*operands)
    return out[:B, :N].reshape(B, 6, dim)


# ---------------------------------------------------------------------------
# Main
# ---------------------------------------------------------------------------

if __name__ == "__main__":
    key = jax.random.PRNGKey(0)
    B, dim, r, alpha = 2, 32, 4, 8
    k1, k2, k3, k4, k5, k6, k7 = jax.random.split(key, 7)

    # inputs
    time_token = jax.random.normal(k1, (B, dim), dtype=jnp.float32)
    time_ada_in = jax.random.normal(k2, (B, 6 * dim), dtype=jnp.float32)

    # parameters (nn.Linear weights stored pre-transposed so kernels do x @ W)
    w_ada = jax.random.normal(k3, (dim, 6 * dim), dtype=jnp.float32) * 0.02
    b_ada = jax.random.normal(k4, (6 * dim,), dtype=jnp.float32) * 0.02
    lora_a = jax.random.normal(k5, (dim, 6 * r), dtype=jnp.float32) * 0.02
    lora_b = jax.random.normal(k6, (6 * r, 6 * dim), dtype=jnp.float32) * 0.02
    scale_shift_table = jax.random.normal(k7, (6, dim), dtype=jnp.float32) * 0.1
    scaling = alpha / r

    # --- mode 'ada' (params padded once at load time, not per call) ---
    wp, bp, N = prepare_ada_params(w_ada, b_ada)
    out_ada = jax.block_until_ready(adaln_ada(time_token, wp, bp, N))
    ref_ada = (time_token @ w_ada + b_ada).reshape(B, 6, dim)
    assert out_ada.shape == (B, 6, dim)
    assert jnp.allclose(out_ada, ref_ada, atol=1e-5), "ada mode mismatch"

    # --- mode 'ada' with bf16 weights (halves the dominant HBM weight read) ---
    wp16, bp16, _ = prepare_ada_params(w_ada.astype(jnp.bfloat16), b_ada)
    out_ada16 = jax.block_until_ready(adaln_ada(time_token, wp16, bp16, N))
    ref_ada16 = (time_token.astype(jnp.bfloat16).astype(jnp.float32)
                 @ w_ada.astype(jnp.bfloat16).astype(jnp.float32)
                 + b_ada).reshape(B, 6, dim)
    assert jnp.allclose(out_ada16, ref_ada16, atol=2e-2), "ada bf16 mismatch"

    # --- mode 'ada_single' (force the Pallas path so the kernel runs) ---
    tbl_p, N1 = prepare_single_params(scale_shift_table)
    out_single = jax.block_until_ready(
        adaln_ada_single(time_ada_in, tbl_p, N1, use_pallas=True))
    ref_single = scale_shift_table[None] + time_ada_in.reshape(B, 6, dim)
    assert jnp.allclose(out_single, ref_single, atol=1e-5), "ada_single mismatch"
    # auto path (tiny B -> fused XLA add) must agree
    out_single_auto = jax.block_until_ready(
        adaln_ada_single(time_ada_in, tbl_p, N1))
    assert jnp.allclose(out_single_auto, ref_single, atol=1e-5), "ada_single auto mismatch"

    # --- mode 'ada_sola' (no bias table -> table-free kernel variant) ---
    a_p, bm_p, _, N2 = prepare_sola_params(lora_a, lora_b)
    out_sola_nb = jax.block_until_ready(
        adaln_ada_sola(time_token, time_ada_in, a_p, bm_p, scaling, N2))
    ref_sola_nb = (time_ada_in
                   + (time_token @ lora_a @ lora_b) * scaling).reshape(B, 6, dim)
    assert jnp.allclose(out_sola_nb, ref_sola_nb, atol=1e-4), "ada_sola mismatch"

    # --- mode 'ada_sola_bias' ---
    a_p, bm_p, tbl_sb, _ = prepare_sola_params(lora_a, lora_b, scale_shift_table)
    out_sola = jax.block_until_ready(
        adaln_ada_sola(time_token, time_ada_in, a_p, bm_p, scaling, N2, tbl_sb))
    ref_sola = ref_sola_nb + scale_shift_table[None]
    assert jnp.allclose(out_sola, ref_sola, atol=1e-4), "ada_sola_bias mismatch"

    print("KERNEL_OK")
</pallas_src>

<mosaic_0001>
module attributes {stable_mosaic.version = 11 : i64} {
  func.func @_ada_kernel(%arg0: i32, %arg1: memref<8x32xf32, #tpu.memory_space<vmem>>, %arg2: memref<32x128xf32, #tpu.memory_space<vmem>>, %arg3: memref<1x128xf32, #tpu.memory_space<vmem>>, %arg4: memref<8x128xf32, #tpu.memory_space<vmem>>) attributes {dimension_semantics = [#tpu.dimension_semantics<parallel>], iteration_bounds = array<i64: 2>, scalar_prefetch = 0 : i64, scratch_operands = 0 : i64, tpu.core_type = #tpu.core_type<tc>, window_params = [{pipeline_mode = #tpu.pipeline_mode<synchronous>, transform_indices = @transform_0, window_bounds = array<i64: 8, 32>}, {transform_indices = @transform_1, window_bounds = array<i64: 32, 128>}, {transform_indices = @transform_2, window_bounds = array<i64: 1, 128>}, {transform_indices = @transform_3, window_bounds = array<i64: 8, 128>}]} {
    %c0 = arith.constant 0 : index
    %c0_0 = arith.constant 0 : index
    %0 = vector.load %arg1[%c0, %c0_0] : memref<8x32xf32, #tpu.memory_space<vmem>>, vector<8x32xf32>
    %c0_1 = arith.constant 0 : index
    %c0_2 = arith.constant 0 : index
    %1 = vector.load %arg2[%c0_1, %c0_2] : memref<32x128xf32, #tpu.memory_space<vmem>>, vector<32x128xf32>
    %cst = arith.constant dense<0.000000e+00> : vector<8x128xf32>
    %2 = tpu.matmul %0, %1, %cst {dimension_numbers = #tpu.dot_dimension_numbers<[1], [0], [0], [1], [0, 0, 1, 1], [], []>} : vector<8x32xf32>, vector<32x128xf32>, vector<8x128xf32> -> vector<8x128xf32>
    %c0_3 = arith.constant 0 : index
    %c0_4 = arith.constant 0 : index
    %3 = vector.load %arg3[%c0_3, %c0_4] : memref<1x128xf32, #tpu.memory_space<vmem>>, vector<1x128xf32>
    %4 = vector.broadcast %3 : vector<1x128xf32> to vector<8x128xf32>
    %5 = arith.addf %2, %4 : vector<8x128xf32>
    %c0_5 = arith.constant 0 : index
    %c0_6 = arith.constant 0 : index
    %6 = vector.load %arg4[%c0_5, %c0_6] : memref<8x128xf32, #tpu.memory_space<vmem>>, vector<8x128xf32>
    tpu.vector_store %arg4[%c0_5, %c0_6], %5 {strides = array<i32>} : memref<8x128xf32, #tpu.memory_space<vmem>>, vector<8x128xf32>,
    return
  }
  func.func @transform_0(%arg0: i32) -> (i32, i32) {
    %c0_i32 = arith.constant 0 : i32
    %c0_i32_0 = arith.constant 0 : i32
    %c0_i32_1 = arith.constant 0 : i32
    return %c0_i32, %c0_i32_0 : i32, i32
  }
  func.func @transform_1(%arg0: i32) -> (i32, i32) {
    %c0_i32 = arith.constant 0 : i32
    %c0_i32_0 = arith.constant 0 : i32
    return %c0_i32, %arg0 : i32, i32
  }
  func.func @transform_2(%arg0: i32) -> (i32, i32) {
    %c0_i32 = arith.constant 0 : i32
    %c0_i32_0 = arith.constant 0 : i32
    return %c0_i32, %arg0 : i32, i32
  }
  func.func @transform_3(%arg0: i32) -> (i32, i32) {
    %c0_i32 = arith.constant 0 : i32
    %c0_i32_0 = arith.constant 0 : i32
    return %c0_i32, %arg0 : i32, i32
  }
}

</mosaic_0001>

<bundles_post_ra>
// kernel: tpu_custom_call.1
= control target key start
LH: loop header
LB: loop body
LE: loop exit
PB: predicated region body
PF: predicated region fallthrough
CT: control target
= control target key end

     0   :  { %8 = vsyncpa [#allocation3], 0  ;;  %s832_s0 = inlined_call_operand.hbm [shape: f32[8,32], index: 0, kind: input, shape index: {}]   ;;  %s833_s1 = inlined_call_operand.hbm [shape: f32[32,256], index: 1, kind: input, shape index: {}]   ;;  %s834_s2 = inlined_call_operand.vmem [shape: f32[1,256], index: 2, kind: input, shape index: {}]   ;;  %s835_s3 = inlined_call_operand.hbm [shape: f32[8,256], index: 3, kind: output, shape index: {}]  }
   0x1   :  { %9 = vsyncpa [#allocation6], 0 }
   0x2   :  { %11 = vsyncpa [#allocation6 + $0x1], 0 }
   0x3   :  { %12 = vsyncpa [#allocation4], 0 }
   0x4   :  { %14 = vsyncpa [#allocation4 + $0x1], 0  ;;  %s653_s12 = smov 0   ;;  %s655_s13 = smov 0  }
   0x5   :  { %s657_s14 = smov 0   ;;  %s659_s15 = smov 0  }
   0x6 LB: > { %s674_s16 = sadd.s32 4294967295, %s623_s15   ;;  %s407_s17 = sadd.s32 4294967294, %s623_s15   ;;  %s623_s15 = sphi %s659_s15, %s858_s15   ;;  %s619_s14 = sphi %s657_s14, %s857_s14   ;;  %s615_s13 = sphi %s655_s13, %s856_s13   ;;  %s611_s12 = sphi %s653_s12, %s855_s12  }
   0x7   : > { %s678_s18 = sadd.s32 1, %s623_s15   ;;  %s48_s19 = sadd.s32 1, %s619_s14 }
   0x8   : > { %s45_s20 = ssub.s32 %s623_s15, %s678_s18  ;;  %p55_p0 = scmp.ne.s32.totalorder %s619_s14, %s615_s13 }
   0x9   : > { %p46_p1 = scmp.eq.s32.totalorder %s45_s20, 0  ;;  %p56_p2 = scmp.eq.s32.totalorder %s623_s15, 0 }
   0xa   : > { %p61_p3 = scmp.ne.s32.totalorder %s615_s13, %s611_s12  ;;  %p836_p4 = scmp.eq.s32.totalorder %s674_s16, 0 }
   0xb   : > { %s690_s21 = scalar_select %p46_p1, %s619_s14, %s48_s19  }
   0xc   : > { %p692_p5 = por %p56_p2, %p55_p0  ;;  %p698_p6 = por %p836_p4, %p61_p3 }
   0xd   : > { %p111_p7 = scmp.eq.s32.totalorder %s674_s16, 1  ;;  %p117_p8 = scmp.eq.s32.totalorder %s407_s17, 1 }
   0xe   : > { %s841_s23 = scalar_select %p698_p6, 1, 0 }
   0xf   : > { %p408_p9 = scmp.ge.s32.totalorder %s623_s15, 1  ;;  %p124_p10 = scmp.lt.s32.totalorder %s623_s15, 3 }
  0x10   : > { %p705_p11 = por %p111_p7, %p55_p0  ;;  %p709_p12 = por %p117_p8, %p61_p3 }
  0x11   : > { %p713_p13 = pnand %p408_p9, %p124_p10  ;;  %s625_s27 = smov [#allocation2]  }
  0x12   : > { %s842_s24 = scalar_select %p705_p11, 1, 0 }
  0x13   : > { %s843_s25 = scalar_select %p709_p12, 1, 0 }
  0x14   : > { %s844_s26 = scalar_select %p713_p13, 1, 0 }
  0x15   : > { %p447_p2 = pneg %p713_p13  ;;  %s137_s28 = sshll.u32 %s625_s27, 4  ;;  %s138_s28 = int_to_ptr.vmem [resolvable:$true] %s137_s28 }
  0x16   : > { %p460_p4 = scmp.lt.s32.totalorder %s623_s15, 2  ;;  %p845_p0 = scmp.eq.s32.totalorder %s674_s16, 0 }
  0x17   : > { %s148_s30 = sand.u32 1, %s619_s14   ;;  %s512_s6 = scalar_lea.vmem %s138_s28, 128 }
  0x18   : > { %p723_p7 = pnand %p447_p2, %p845_p0  ;;  %p730_p3 = pnand %p460_p4, %p692_p5 }
  0x19   : > { %s411_s5 = sshll.u32 %s148_s30, 5  ;;  %p513_p9 = scmp.ne.s32.totalorder %s138_s28, %s512_s6 }
  0x1a   : > { %p503_p8 = pneg %p723_p7  ;;  %p520_p12 = scmp.lt.s32.totalorder %s138_s28, %s138_s28 }
  0x1b   : > { %p521_p11 = scmp.lt.s32.totalorder %s512_s6, %s512_s6 }
  0x1c   : > { %p515_p10 = pnand %p513_p9, %p503_p8 }
  0x1d   : > { %p522_p2 = por %p521_p11, %p520_p12 }
  0x1e   : > { %p516_p1 = pneg %p515_p10 }
  0x20   : > { %p523_p0 = pnand %p522_p2, %p516_p1 }
  0x22   : > { %526 = shalt.err (!%p523_p0)
}
  0x23   : > { %450 = dma.hbm_to_vmem [thread:$0]  (!%p723_p7), %s832_s0, 128, %s138_s28, [#allocation3]  }
  0x24   : > { %s412_s9 = sshll.u32 %s623_s15, 7  ;;  %s152_s10 = scalar_lea.vmem [#allocation5], %s411_s5 }
  0x25   : > { %s158_s11 = sshll.u32 %s152_s10, 4  ;;  %s745_s20 = scalar_lea.hbm %s833_s1, %s412_s9  ;;  %s747_s11 = int_to_ptr.vmem [resolvable:$true] %s158_s11 }
  0x26   : > { %s749_s22 = scalar_lea.sflag [#allocation6], %s148_s30  ;;  %s527_s27 = scalar_lea.hbm %s745_s20, 512 }
  0x27   : > { %p528_p4 = scmp.ne.s32.totalorder %s745_s20, %s527_s27  ;;  %p529_p5 = pneg %p730_p3 }
  0x28   : > { %s532_s5 = scalar_lea.hbm %s833_s1, 1024  ;;  %p533_p1 = scmp.lt.s32.totalorder %s745_s20, %s833_s1 }
  0x29   : > { %p530_p11 = pnand %p529_p5, %p528_p4  ;;  %p534_p7 = scmp.lt.s32.totalorder %s532_s5, %s527_s27 }
  0x2b   : > { %p531_p12 = pneg %p530_p11  ;;  %p535_p8 = por %p534_p7, %p533_p1 }
  0x2d   : > { %p536_p9 = pnand %p535_p8, %p531_p12 }
  0x2f   : > { %539 = shalt.err (!%p536_p9)
}
  0x30   : > { %s540_s30 = scalar_lea.vmem %s747_s11, 512  ;;  %s626_s8 = smov [#allocation5]  }
  0x31   : > { %p541_p10 = scmp.ne.s32.totalorder %s747_s11, %s540_s30  ;;  %s545_s9 = sshll.u32 %s626_s8, 4  ;;  %s546_s9 = int_to_ptr.vmem [resolvable:$false] %s545_s9 }
  0x32   : > { %s547_s10 = scalar_lea.vmem %s546_s9, 1024  ;;  %p548_p4 = scmp.lt.s32.totalorder %s747_s11, %s546_s9 }
  0x33   : > { %p543_p2 = pnand %p541_p10, %p529_p5  ;;  %p549_p11 = scmp.lt.s32.totalorder %s547_s10, %s540_s30 }
  0x35   : > { %p544_p0 = pneg %p543_p2  ;;  %p550_p6 = por %p549_p11, %p548_p4 }
  0x37   : > { %p551_p13 = pnand %p550_p6, %p544_p0 }
  0x39   : > { %554 = shalt.err (!%p551_p13)
}
  0x3a   : > { %s627_s17 = smov 256   ;;  %s628_s19 = smov 128  }
  0x3b   : > { %s629_s27 = smov 8   ;;  %p848_p5 = scmp.ne.s32.totalorder %s844_s26, 0 }
  0x3c   : > { %454 = dma.hbm_to_vmem [thread:$0]  (!%p730_p3), %s745_s20, 512, %s747_s11, %s749_s22, %s627_s17, %s628_s19, %s629_s27  }
  0x3d   : > { %176 = sbr.rel (%p848_p5) target bundleno = 288 (0x120), region = 32  ;;  %p849_p12 = scmp.eq.s32.totalorder (!%p848_p5), %s674_s16, 0 }
  0x42   : > { %598 = dma.done.wait (%p849_p12), [#allocation3], 128   ;;  %p850_p1 = pmov %p849_p12 }
  0x43   : > { %s777_s28 = sand.u32 1, %s615_s13   ;;  %p851_p6 = scmp.ne.s32.totalorder %s841_s23, 0 }
  0x44   : > { %600 = vsyncadd (%p850_p1), [#allocation3], 4294967168  ;;  %s415_s29 = sshll.u32 %s777_s28, 5  ;;  %s183_s5 = scalar_lea.sflag [#allocation6], %s777_s28 }
  0x45   : > { %s186_s6 = scalar_lea.vmem [#allocation5], %s415_s29 }
  0x46   : > { %602 = dma.done.wait (%p851_p6), %s183_s5, 512  }
  0x47   : > { %604 = vsyncadd (%p851_p6), %s183_s5, 4294966784  ;;  %v630_v0 = vmov 0.0   ;;  %vm631_vm0 = vmmov 0   ;;  %v219_v1 = vld [vmem:[%s186_s6 + $0x18] sm:$0xff]  ;;  %v218_v2 = vld [vmem:[%s186_s6 + $0x10] sm:$0xff]  ;;  %vm227_vm1 = vcmask 261120  }
  0x48   : > { %428 = vmatprep.subr.mxu0 %v630_v0  ;;  %436 = vmatprep.mubr.msk.f32.mxu0 %vm631_vm0, %v630_v0  ;;  %v217_v3 = vld [vmem:[%s186_s6 + $0x8] sm:$0xff]  ;;  %v216_v4 = vld [vmem:[%s186_s6] sm:$0xff]  ;;  %v215_v5 = vld [vmem:[#allocation2] sm:$0xff]  ;;  %p212_p13 = scmp.lt.s32.totalorder %s674_s16, 1  ;;  %s416_s26 = sshll.u32 %s777_s28, 3 }
  0x49   : > { %429 = vmatpush3.msra.mxu0 %v219_v1  ;;  %s420_s22 = sshll.u32 %s674_s16, 7  ;;  %s211_s7 = scalar_lea.vmem [#allocation7], %s416_s26 }
  0x4a   : > { %430 = vmatprep.subr.mxu0 %v630_v0  ;;  %s213_s23 = scalar_select %p212_p13, %s674_s16, 1 }
  0x4b   : > { %431 = vmatpush3.msra.mxu0 %v218_v2  ;;  %s316_s30 = sshll.u32 %s211_s7, 4  ;;  %s795_s10 = scalar_lea.hbm %s835_s3, %s420_s22  ;;  %s317_s30 = int_to_ptr.vmem [resolvable:$true] %s316_s30 }
  0x4c   : > { %432 = vmatprep.subr.mxu0 %v630_v0  ;;  %s214_s20 = scalar_lea.vmem %s834_s2, %s213_s23  ;;  %s303_s17 = scalar_lea.sflag [#allocation4], %s777_s28 }
  0x4d   : > { %433 = vmatpush3.msra.mxu0 %v217_v3  ;;  %v417_v6 = vld [vmem:[%s214_s20] ss:$0 sm:$0xff]  ;;  %s555_s19 = scalar_lea.vmem %s317_s30, 128  ;;  %p852_p7 = scmp.ne.s32.totalorder %s842_s24, 0 }
  0x4e   : > { %434 = vmatprep.subr.mxu0 %v630_v0  ;;  %p556_p3 = scmp.ne.s32.totalorder %s317_s30, %s555_s19  ;;  %s632_s27 = smov [#allocation7]  }
  0x4f   : > { %435 = vmatpush3.msra.mxu0 %v216_v4  ;;  %s559_s16 = sshll.u32 %s632_s27, 4  ;;  %s560_s16 = int_to_ptr.vmem [resolvable:$false] %s559_s16 }
  0x50   : > { %437 = vmatmul.mubr.msk.f32.vlgmr.msra.gmra.mxu0 %vm227_vm1, %v215_v5  ;;  %p557_p8 = pnand %p556_p3, %p852_p7  ;;  %s561_s29 = scalar_lea.vmem %s560_s16, 256 }
  0x51   : > { %p562_p10 = scmp.lt.s32.totalorder %s317_s30, %s560_s16  ;;  %p563_p2 = scmp.lt.s32.totalorder %s561_s29, %s555_s19 }
  0x52   : > { %p558_p9 = pneg %p557_p8 }
  0x53   : > { %p564_p0 = por %p563_p2, %p562_p10 }
  0x55   : > { %p565_p4 = pnand %p564_p0, %p558_p9 }
 0x110   : > { %v297_v7 = vpop.f32.mrf.mxu0 }
 0x111   : > { %v298_v8 = vadd.f32 %v417_v6, %v297_v7 }
 0x112   : > { %v438_v9 = vpop.f32.mrf.mxu0 }
 0x113   : > { %301 = vst [vmem:[%s211_s7] sm:$0xff] %v298_v8 }
 0x114   : > { %568 = shalt.err (!%p565_p4)
}
 0x115   : > { %s569_s5 = scalar_lea.hbm %s795_s10, 128  ;;  %s573_s23 = scalar_lea.hbm %s835_s3, 256 }
 0x116   : > { %p570_p11 = scmp.ne.s32.totalorder %s795_s10, %s569_s5  ;;  %p574_p1 = scmp.lt.s32.totalorder %s795_s10, %s835_s3 }
 0x117   : > { %p575_p6 = scmp.lt.s32.totalorder %s573_s23, %s569_s5 }
 0x118   : > { %p571_p5 = pnand %p570_p11, %p852_p7 }
 0x119   : > { %p576_p13 = por %p575_p6, %p574_p1 }
 0x11a   : > { %p572_p12 = pneg %p571_p5 }
 0x11c   : > { %p577_p3 = pnand %p576_p13, %p572_p12 }
 0x11e   : > { %580 = shalt.err (!%p577_p3)
}
 0x11f   : > { %445 = dma.vmem_to_hbm [thread:$0]  (%p852_p7), %s317_s30, 128, %s795_s10, %s303_s17  }
 0x120 PF: > { %s328_s11 = sand.u32 1, %s611_s12   ;;  %p853_p8 = scmp.ne.s32.totalorder %s843_s25, 0 }
 0x121   : > { %p854_p9 = scmp.ge.s32.totalorder %s623_s15, 2  ;;  %s329_s20 = scalar_lea.sflag [#allocation4], %s328_s11 }
 0x123   : > { %p456_p10 = pnand %p854_p9, %p853_p8 }
 0x125   : > { %p457_p2 = pneg %p456_p10 }
 0x127   : > { %606 = dma.done.wait (%p457_p2), %s329_s20, 128  }
 0x128   : > { %608 = vsyncadd (%p457_p2), %s329_s20, 4294967168  ;;  %p17_p0 = scmp.ge.s32.totalorder %s678_s18, 4   ;;  %s855_s12 = smov %s615_s13 }
 0x129   : > { %s856_s13 = smov %s619_s14  ;;  %s857_s14 = smov %s690_s21 }
 0x12a   : > { %s858_s15 = smov %s678_s18  ;;  %19 = sbr.rel (!%p17_p0) target bundleno = 6 (0x6), region = 85 }
 0x12f   :  { %334 = vsyncpa [#allocation3], 1 }
 0x130   :  { %336 = vsyncpa [#allocation3 + $0x1], 1 }
 0x131   :  { %337 = vsyncpa [#allocation6], 1 }
 0x132   :  { %339 = vsyncpa [#allocation6 + $0x1], 1 }
 0x133   :  { %340 = vsyncpa [#allocation4], 1 }
 0x134   :  { %342 = vsyncpa [#allocation4 + $0x1], 1 }

</bundles_post_ra>
